<compile_context>
chip_gen: v6e
topology: v6e:2x2x1
jax: 0.10.0
libtpu: 0.0.40
codegen_flags: <defaults>
</compile_context>

<pallas_src>
import functools

import jax
import jax.numpy as jnp
from jax.experimental import pallas as pl
from jax.experimental.pallas import tpu as pltpu

_LANE = 128
_SUBLANE = 8
_TILE_BUDGET_BYTES = 8 * 1024 * 1024  # per logits buffer (x2 double-buffered)


def _ce_kernel(logits_ref, targets_ref, out_ref, m_sc, s_sc, t_sc,
               *, n_rows, n_cols, tn, tc, mask_rows, mask_cols):
    j = pl.program_id(1)
    nj = pl.num_programs(1)

    @pl.when(j == 0)
    def _init():
        m_sc[...] = jnp.full(m_sc.shape, -jnp.inf, dtype=jnp.float32)
        s_sc[...] = jnp.zeros(s_sc.shape, dtype=jnp.float32)
        t_sc[...] = jnp.zeros(t_sc.shape, dtype=jnp.float32)

    # TODO(synk): on v6e/v7x a bf16 input could keep the max/compare/select in
    # bf16 and upcast only for exp/log accumulation; we upcast immediately so
    # the same code is correct on v5e (no bf16 VPU/EUP).
    logits = logits_ref[...].astype(jnp.float32)            # (tn, tc)
    tgt = targets_ref[...]                                   # (tn, 1) int32

    # global class index of each column in this tile
    col = jax.lax.broadcasted_iota(jnp.int32, (tn, tc), 1) + j * tc
    if mask_cols:  # C not divisible by tc: neutralize out-of-range columns
        logits = jnp.where(col < n_cols, logits, -jnp.inf)

    # --- single fused pass over the tile: online logsumexp + target gather ---
    tile_max = jnp.max(logits, axis=-1, keepdims=True)       # (tn, 1)
    m_new = jnp.maximum(m_sc[...], tile_max)
    corr = jnp.exp(m_sc[...] - m_new)
    p = jnp.exp(logits - m_new)
    s_sc[...] = s_sc[...] * corr + jnp.sum(p, axis=-1, keepdims=True)
    # valid targets are always < n_cols, so masked columns never match
    t_sc[...] = t_sc[...] + jnp.sum(jnp.where(col == tgt, logits, 0.0),
                                    axis=-1, keepdims=True)
    m_sc[...] = m_new

    @pl.when(j == nj - 1)
    def _finalize():
        per_row = m_sc[...] + jnp.log(s_sc[...]) - t_sc[...]  # (tn, 1)
        if mask_rows:  # N not divisible by tn: zero padded rows
            row = (jax.lax.broadcasted_iota(jnp.int32, (tn, 1), 0)
                   + pl.program_id(0) * tn)
            per_row = jnp.where(row < n_rows, per_row, 0.0)
        out_ref[...] = per_row


def _choose_row_tile(n):
    for cand in (512, 256, 128, 64, 32, 16, 8):
        if n % cand == 0:
            return cand
    if n < 512:
        return n          # block == full dim is always a legal block shape
    return 512            # cdiv grid + in-kernel row masking


def _choose_col_tile(c, tn, itemsize):
    max_tc = max(_LANE, _TILE_BUDGET_BYTES // max(1, tn * itemsize))
    if c <= max_tc:
        return c          # whole class dim in one lane-dense slab
    tc = (max_tc // _LANE) * _LANE
    while tc > _LANE and c % tc != 0:
        tc -= _LANE
    if c % tc == 0:
        return tc
    return min((max_tc // _LANE) * _LANE, 2048)  # cdiv grid + column masking


def ce_loss(outputs, targets, *, row_block=None, col_block=None):
    """CrossEntropyLoss(reduction='sum')(outputs, targets) / N  (== mean CE)."""
    n, c = outputs.shape
    itemsize = jnp.dtype(outputs.dtype).itemsize

    tn = row_block if row_block is not None else _choose_row_tile(n)
    tc = col_block if col_block is not None else _choose_col_tile(c, tn, itemsize)
    assert tn == n or tn % _SUBLANE == 0, "row block must be N or a multiple of 8"
    assert tc == c or tc % _LANE == 0, "class block must be C or a multiple of 128"

    num_i = pl.cdiv(n, tn)
    num_j = pl.cdiv(c, tc)
    mask_rows = (n % tn) != 0
    mask_cols = (c % tc) != 0

    targets_2d = targets.astype(jnp.int32).reshape(n, 1)

    kernel = functools.partial(
        _ce_kernel, n_rows=n, n_cols=c, tn=tn, tc=tc,
        mask_rows=mask_rows, mask_cols=mask_cols)

    # scoped-VMEM request: double-buffered logits tiles + small lane-padded refs
    lane_pad_bytes = tn * _LANE * 4
    vmem_needed = (2 * tn * tc * itemsize      # logits double buffer
                   + 2 * lane_pad_bytes        # targets blocks
                   + 2 * lane_pad_bytes        # per-row-loss output blocks
                   + 3 * lane_pad_bytes)       # m / s / t scratch
    vmem_limit = int(min(64 * 2**20, max(32 * 2**20, vmem_needed + 4 * 2**20)))

    cost = pl.CostEstimate(
        flops=6 * n * c,
        transcendentals=n * c + n,
        bytes_accessed=n * c * itemsize + n * 4 + num_i * tn * 4)

    per_row = pl.pallas_call(
        kernel,
        out_shape=jax.ShapeDtypeStruct((num_i * tn, 1), jnp.float32),
        grid_spec=pltpu.PrefetchScalarGridSpec(
            num_scalar_prefetch=0,
            grid=(num_i, num_j),
            in_specs=[
                pl.BlockSpec((tn, tc), lambda i, j: (i, j)),   # logits tile
                pl.BlockSpec((tn, 1), lambda i, j: (i, 0)),    # targets (per row tile)
            ],
            out_specs=pl.BlockSpec((tn, 1), lambda i, j: (i, 0)),
            scratch_shapes=[
                pltpu.VMEM((tn, 1), jnp.float32),   # running max
                pltpu.VMEM((tn, 1), jnp.float32),   # running exp-sum
                pltpu.VMEM((tn, 1), jnp.float32),   # target-logit accumulator
            ]),
        compiler_params=pltpu.CompilerParams(
            dimension_semantics=("parallel", "arbitrary"),
            vmem_limit_bytes=vmem_limit),
        cost_estimate=cost,
    )(outputs, targets_2d)

    # padded rows (if any) were written as 0, so summing the whole output is safe
    return jnp.sum(per_row) / jnp.float32(n)


def _ref_ce(logits, targets):
    logits = logits.astype(jnp.float32)
    lse = jax.nn.logsumexp(logits, axis=-1)
    tgt = jnp.take_along_axis(logits, targets[:, None].astype(jnp.int32),
                              axis=-1)[:, 0]
    return jnp.sum(lse - tgt) / logits.shape[0]


if __name__ == "__main__":
    key = jax.random.PRNGKey(0)
    k1, k2, k3, k4 = jax.random.split(key, 4)

    # Case 1: auto-tiled (single class slab), batch=64, classes=256
    N1, C1 = 64, 256
    logits1 = jax.random.normal(k1, (N1, C1), dtype=jnp.float32)
    targets1 = jax.random.randint(k2, (N1,), 0, C1, dtype=jnp.int32)
    loss1 = ce_loss(logits1, targets1)
    jax.block_until_ready(loss1)
    ref1 = _ref_ce(logits1, targets1)
    assert jnp.allclose(loss1, ref1, atol=1e-4, rtol=1e-4), (loss1, ref1)

    # Case 2: forced small tiles -> exercises multiple row tiles and the
    # online (streaming) logsumexp across several class tiles.
    N2, C2 = 32, 384
    logits2 = jax.random.normal(k3, (N2, C2), dtype=jnp.float32) * 3.0
    targets2 = jax.random.randint(k4, (N2,), 0, C2, dtype=jnp.int32)
    loss2 = ce_loss(logits2, targets2, row_block=16, col_block=128)
    jax.block_until_ready(loss2)
    ref2 = _ref_ce(logits2, targets2)
    assert jnp.allclose(loss2, ref2, atol=1e-4, rtol=1e-4), (loss2, ref2)

    print("KERNEL_OK")
</pallas_src>

<mosaic_0001>
module attributes {stable_mosaic.version = 11 : i64} {
  func.func @_ce_kernel(%arg0: i32, %arg1: i32, %arg2: memref<64x256xf32, #tpu.memory_space<vmem>>, %arg3: memref<64x1xi32, #tpu.memory_space<vmem>>, %arg4: memref<64x1xf32, #tpu.memory_space<vmem>>, %arg5: memref<64x1xf32, #tpu.memory_space<vmem>>, %arg6: memref<64x1xf32, #tpu.memory_space<vmem>>, %arg7: memref<64x1xf32, #tpu.memory_space<vmem>>) attributes {dimension_semantics = [#tpu.dimension_semantics<parallel>, #tpu.dimension_semantics<arbitrary>], iteration_bounds = array<i64: 1, 1>, scalar_prefetch = 0 : i64, scratch_operands = 3 : i64, tpu.core_type = #tpu.core_type<tc>, window_params = [{transform_indices = @transform_0, window_bounds = array<i64: 64, 256>}, {transform_indices = @transform_1, window_bounds = array<i64: 64, 1>}, {transform_indices = @transform_2, window_bounds = array<i64: 64, 1>}]} {
    %c0_i32 = arith.constant 0 : i32
    %0 = arith.cmpi eq, %arg1, %c0_i32 : i32
    %1 = arith.extui %0 : i1 to i32
    %c0_i32_0 = arith.constant 0 : i32
    %2 = arith.cmpi ne, %1, %c0_i32_0 : i32
    scf.if %2 {
      %cst_23 = arith.constant 0xFF800000 : f32
      %38 = vector.broadcast %cst_23 : f32 to vector<64x1xf32>
      %c0_24 = arith.constant 0 : index
      %c0_25 = arith.constant 0 : index
      %39 = vector.load %arg5[%c0_24, %c0_25] : memref<64x1xf32, #tpu.memory_space<vmem>>, vector<64x1xf32>
      tpu.vector_store %arg5[%c0_24, %c0_25], %38 {strides = array<i32>} : memref<64x1xf32, #tpu.memory_space<vmem>>, vector<64x1xf32>,
      %cst_26 = arith.constant 0.000000e+00 : f32
      %40 = vector.broadcast %cst_26 : f32 to vector<64x1xf32>
      %c0_27 = arith.constant 0 : index
      %c0_28 = arith.constant 0 : index
      %41 = vector.load %arg6[%c0_27, %c0_28] : memref<64x1xf32, #tpu.memory_space<vmem>>, vector<64x1xf32>
      tpu.vector_store %arg6[%c0_27, %c0_28], %40 {strides = array<i32>} : memref<64x1xf32, #tpu.memory_space<vmem>>, vector<64x1xf32>,
      %cst_29 = arith.constant 0.000000e+00 : f32
      %42 = vector.broadcast %cst_29 : f32 to vector<64x1xf32>
      %c0_30 = arith.constant 0 : index
      %c0_31 = arith.constant 0 : index
      %43 = vector.load %arg7[%c0_30, %c0_31] : memref<64x1xf32, #tpu.memory_space<vmem>>, vector<64x1xf32>
      tpu.vector_store %arg7[%c0_30, %c0_31], %42 {strides = array<i32>} : memref<64x1xf32, #tpu.memory_space<vmem>>, vector<64x1xf32>,
    } else {
    }
    %c0 = arith.constant 0 : index
    %c0_1 = arith.constant 0 : index
    %3 = vector.load %arg2[%c0, %c0_1] : memref<64x256xf32, #tpu.memory_space<vmem>>, vector<64x256xf32>
    %c0_2 = arith.constant 0 : index
    %c0_3 = arith.constant 0 : index
    %4 = vector.load %arg3[%c0_2, %c0_3] : memref<64x1xi32, #tpu.memory_space<vmem>>, vector<64x1xi32>
    %5 = tpu.iota {dimensions = array<i32: 1>} : vector<64x256xi32>
    %c256_i32 = arith.constant 256 : i32
    %6 = arith.muli %arg1, %c256_i32 : i32
    %7 = vector.broadcast %6 : i32 to vector<64x256xi32>
    %8 = arith.addi %5, %7 : vector<64x256xi32>
    %cst = arith.constant dense<0xFF800000> : vector<64xf32>
    %9 = vector.multi_reduction <maximumf>, %3, %cst [1] : vector<64x256xf32> to vector<64xf32>
    %10 = vector.shape_cast %9 : vector<64xf32> to vector<64x1xf32>
    %c0_4 = arith.constant 0 : index
    %c0_5 = arith.constant 0 : index
    %11 = vector.load %arg5[%c0_4, %c0_5] : memref<64x1xf32, #tpu.memory_space<vmem>>, vector<64x1xf32>
    %12 = arith.maximumf %11, %10 : vector<64x1xf32>
    %c0_6 = arith.constant 0 : index
    %c0_7 = arith.constant 0 : index
    %13 = vector.load %arg5[%c0_6, %c0_7] : memref<64x1xf32, #tpu.memory_space<vmem>>, vector<64x1xf32>
    %14 = arith.subf %13, %12 : vector<64x1xf32>
    %15 = math.exp %14 : vector<64x1xf32>
    %16 = vector.broadcast %12 : vector<64x1xf32> to vector<64x256xf32>
    %17 = arith.subf %3, %16 : vector<64x256xf32>
    %18 = math.exp %17 : vector<64x256xf32>
    %c0_8 = arith.constant 0 : index
    %c0_9 = arith.constant 0 : index
    %19 = vector.load %arg6[%c0_8, %c0_9] : memref<64x1xf32, #tpu.memory_space<vmem>>, vector<64x1xf32>
    %20 = arith.mulf %19, %15 : vector<64x1xf32>
    %cst_10 = arith.constant dense<0.000000e+00> : vector<64xf32>
    %21 = vector.multi_reduction <add>, %18, %cst_10 [1] : vector<64x256xf32> to vector<64xf32>
    %22 = vector.shape_cast %21 : vector<64xf32> to vector<64x1xf32>
    %23 = arith.addf %20, %22 : vector<64x1xf32>
    %c0_11 = arith.constant 0 : index
    %c0_12 = arith.constant 0 : index
    %24 = vector.load %arg6[%c0_11, %c0_12] : memref<64x1xf32, #tpu.memory_space<vmem>>, vector<64x1xf32>
    tpu.vector_store %arg6[%c0_11, %c0_12], %23 {strides = array<i32>} : memref<64x1xf32, #tpu.memory_space<vmem>>, vector<64x1xf32>,
    %c0_13 = arith.constant 0 : index
    %c0_14 = arith.constant 0 : index
    %25 = vector.load %arg7[%c0_13, %c0_14] : memref<64x1xf32, #tpu.memory_space<vmem>>, vector<64x1xf32>
    %26 = vector.broadcast %4 : vector<64x1xi32> to vector<64x256xi32>
    %27 = arith.cmpi eq, %8, %26 : vector<64x256xi32>
    %cst_15 = arith.constant 0.000000e+00 : f32
    %28 = vector.broadcast %cst_15 : f32 to vector<64x256xf32>
    %29 = arith.select %27, %3, %28 : vector<64x256xi1>, vector<64x256xf32>
    %cst_16 = arith.constant dense<0.000000e+00> : vector<64xf32>
    %30 = vector.multi_reduction <add>, %29, %cst_16 [1] : vector<64x256xf32> to vector<64xf32>
    %31 = vector.shape_cast %30 : vector<64xf32> to vector<64x1xf32>
    %32 = arith.addf %25, %31 : vector<64x1xf32>
    %c0_17 = arith.constant 0 : index
    %c0_18 = arith.constant 0 : index
    %33 = vector.load %arg7[%c0_17, %c0_18] : memref<64x1xf32, #tpu.memory_space<vmem>>, vector<64x1xf32>
    tpu.vector_store %arg7[%c0_17, %c0_18], %32 {strides = array<i32>} : memref<64x1xf32, #tpu.memory_space<vmem>>, vector<64x1xf32>,
    %c0_19 = arith.constant 0 : index
    %c0_20 = arith.constant 0 : index
    %34 = vector.load %arg5[%c0_19, %c0_20] : memref<64x1xf32, #tpu.memory_space<vmem>>, vector<64x1xf32>
    tpu.vector_store %arg5[%c0_19, %c0_20], %12 {strides = array<i32>} : memref<64x1xf32, #tpu.memory_space<vmem>>, vector<64x1xf32>,
    %c0_i32_21 = arith.constant 0 : i32
    %35 = arith.cmpi eq, %arg1, %c0_i32_21 : i32
    %36 = arith.extui %35 : i1 to i32
    %c0_i32_22 = arith.constant 0 : i32
    %37 = arith.cmpi ne, %36, %c0_i32_22 : i32
    scf.if %37 {
      %c0_23 = arith.constant 0 : index
      %c0_24 = arith.constant 0 : index
      %38 = vector.load %arg5[%c0_23, %c0_24] : memref<64x1xf32, #tpu.memory_space<vmem>>, vector<64x1xf32>
      %c0_25 = arith.constant 0 : index
      %c0_26 = arith.constant 0 : index
      %39 = vector.load %arg6[%c0_25, %c0_26] : memref<64x1xf32, #tpu.memory_space<vmem>>, vector<64x1xf32>
      %40 = math.log %39 : vector<64x1xf32>
      %41 = arith.addf %38, %40 : vector<64x1xf32>
      %c0_27 = arith.constant 0 : index
      %c0_28 = arith.constant 0 : index
      %42 = vector.load %arg7[%c0_27, %c0_28] : memref<64x1xf32, #tpu.memory_space<vmem>>, vector<64x1xf32>
      %43 = arith.subf %41, %42 : vector<64x1xf32>
      %c0_29 = arith.constant 0 : index
      %c0_30 = arith.constant 0 : index
      %44 = vector.load %arg4[%c0_29, %c0_30] : memref<64x1xf32, #tpu.memory_space<vmem>>, vector<64x1xf32>
      tpu.vector_store %arg4[%c0_29, %c0_30], %43 {strides = array<i32>} : memref<64x1xf32, #tpu.memory_space<vmem>>, vector<64x1xf32>,
    } else {
    }
    return
  }
  func.func @transform_0(%arg0: i32, %arg1: i32) -> (i32, i32) {
    %c0_i32 = arith.constant 0 : i32
    return %arg0, %arg1 : i32, i32
  }
  func.func @transform_1(%arg0: i32, %arg1: i32) -> (i32, i32) {
    %c0_i32 = arith.constant 0 : i32
    %c0_i32_0 = arith.constant 0 : i32
    return %arg0, %c0_i32 : i32, i32
  }
  func.func @transform_2(%arg0: i32, %arg1: i32) -> (i32, i32) {
    %c0_i32 = arith.constant 0 : i32
    %c0_i32_0 = arith.constant 0 : i32
    return %arg0, %c0_i32 : i32, i32
  }
}

</mosaic_0001>

<bundles_post_ra>
// kernel: tpu_custom_call.1
= control target key start
LH: loop header
LB: loop body
LE: loop exit
PB: predicated region body
PF: predicated region fallthrough
CT: control target
= control target key end

     0   :  { %7 = vsyncpa [#allocation6], 0  ;;  %s572_s9 = smov [#allocation5]   ;;  %s887_s0 = inlined_call_operand.hbm [shape: f32[64,256], index: 0, kind: input, shape index: {}]   ;;  %s888_s1 = inlined_call_operand.vmem [shape: s32[64,1], index: 1, kind: input, shape index: {}]   ;;  %s889_s2 = inlined_call_operand.vmem [shape: f32[64,1], index: 2, kind: output, shape index: {}]  }
   0x1   :  { %s13_s10 = sshll.u32 %s572_s9, 4  ;;  %s14_s10 = int_to_ptr.vmem [resolvable:$true] %s13_s10 }
   0x2   :  { %s558_s11 = scalar_lea.vmem %s14_s10, 2048  ;;  %p563_p1 = scmp.lt.s32.totalorder %s14_s10, %s14_s10 }
   0x3   :  { %p559_p0 = scmp.ne.s32.totalorder %s14_s10, %s558_s11  ;;  %p564_p2 = scmp.lt.s32.totalorder %s558_s11, %s558_s11 }
   0x5   :  { %p565_p3 = por %p564_p2, %p563_p1 }
   0x7   :  { %p566_p4 = pnand %p565_p3, %p559_p0 }
   0x9   :  { %569 = shalt.err (!%p566_p4)
}
   0xa   :  { %s573_s12 = smov 256   ;;  %s574_s13 = smov 16  }
   0xb   :  { %19 = dma.hbm_to_vmem [thread:$0]  %s887_s0, 2048, %s14_s10, [#allocation6], %s573_s12, %s573_s12, %s574_s13  }
   0xc   :  { %570 = dma.done.wait [#allocation6], 2048  }
   0xd   :  { %571 = vsyncadd [#allocation6], 4294965248  ;;  %vm29_vm0 = vcmask 7168   ;;  %v575_v0 = vmov -inf   ;;  %v604_v1 = vld [vmem:[#allocation5] sm:$0xff]  ;;  %v606_v2 = vld [vmem:[#allocation5 + $0x8] sm:$0xff] }
   0xe   :  { %30 = vst.msk [vmem:[#allocation2] sm:$0xff] %vm29_vm0, %v575_v0  ;;  %31 = vst.msk [vmem:[#allocation2 + $0x8] sm:$0xff] %vm29_vm0, %v575_v0  ;;  %v608_v3 = vld [vmem:[#allocation5 + $0x10] sm:$0xff]  ;;  %v85_v4 = vmax.f32 %v604_v1, %v606_v2  ;;  %v612_v5 = vld [vmem:[#allocation5 + $0x18] sm:$0xff]  ;;  %v576_v25 = vmov 0   ;;  %v577_v26 = vmov 0.0  }
   0xf   :  { %32 = vst.msk [vmem:[#allocation2 + $0x10] sm:$0xff] %vm29_vm0, %v575_v0  ;;  %33 = vst.msk [vmem:[#allocation2 + $0x18] sm:$0xff] %vm29_vm0, %v575_v0  ;;  %v614_v6 = vld [vmem:[#allocation5 + $0x20] sm:$0xff]  ;;  %v616_v7 = vld [vmem:[#allocation5 + $0x28] sm:$0xff]  ;;  %v88_v11 = vmax.f32 %v608_v3, %v612_v5  ;;  %484 = vset.pattern.permute.xlu0 %v576_v25  ;;  %485 = vset.pattern.permute.xlu1 %v576_v25 }
  0x10   :  { %34 = vst.msk [vmem:[#allocation2 + $0x20] sm:$0xff] %vm29_vm0, %v575_v0  ;;  %35 = vst.msk [vmem:[#allocation2 + $0x28] sm:$0xff] %vm29_vm0, %v575_v0  ;;  %v91_v8 = vmax.f32 %v614_v6, %v616_v7  ;;  %v620_v9 = vld [vmem:[#allocation5 + $0x30] sm:$0xff]  ;;  %v622_v10 = vld [vmem:[#allocation5 + $0x38] sm:$0xff]  ;;  %86 = vmax.xlane.f32.xlu0 %v85_v4 }
  0x11   :  { %36 = vst.msk [vmem:[#allocation2 + $0x30] sm:$0xff] %vm29_vm0, %v575_v0  ;;  %37 = vst.msk [vmem:[#allocation2 + $0x38] sm:$0xff] %vm29_vm0, %v575_v0  ;;  %v94_v12 = vmax.f32 %v620_v9, %v622_v10  ;;  %v628_v13 = vld [vmem:[#allocation5 + $0x40] sm:$0xff]  ;;  %v630_v14 = vld [vmem:[#allocation5 + $0x48] sm:$0xff] }
  0x12   :  { %92 = vmax.xlane.f32.xlu1 %v91_v8  ;;  %v632_v15 = vld [vmem:[#allocation5 + $0x50] sm:$0xff]  ;;  %v634_v16 = vld [vmem:[#allocation5 + $0x58] sm:$0xff]  ;;  %v97_v17 = vmax.f32 %v628_v13, %v630_v14  ;;  %v640_v19 = vld [vmem:[#allocation5 + $0x60] sm:$0xff]  ;;  %38 = vst.msk [vmem:[#allocation3] sm:$0xff] %vm29_vm0, %v577_v26 }
  0x13   :  { %v100_v18 = vmax.f32 %v632_v15, %v634_v16  ;;  %v642_v20 = vld [vmem:[#allocation5 + $0x68] sm:$0xff]  ;;  %v644_v21 = vld [vmem:[#allocation5 + $0x70] sm:$0xff]  ;;  %v646_v22 = vld [vmem:[#allocation5 + $0x78] sm:$0xff]  ;;  %39 = vst.msk [vmem:[#allocation3 + $0x8] sm:$0xff] %vm29_vm0, %v577_v26 }
  0x14   :  { %89 = vmax.xlane.f32.xlu0 %v88_v11  ;;  %v103_v23 = vmax.f32 %v640_v19, %v642_v20  ;;  %v106_v24 = vmax.f32 %v644_v21, %v646_v22  ;;  %40 = vst.msk [vmem:[#allocation3 + $0x10] sm:$0xff] %vm29_vm0, %v577_v26  ;;  %41 = vst.msk [vmem:[#allocation3 + $0x18] sm:$0xff] %vm29_vm0, %v577_v26  ;;  %v71_v37 = vld [vmem:[%s888_s1 + $0x8] sm:$0xff]  ;;  %v73_v45 = vld [vmem:[%s888_s1 + $0x18] sm:$0xff] }
  0x15   :  { %42 = vst.msk [vmem:[#allocation3 + $0x20] sm:$0xff] %vm29_vm0, %v577_v26  ;;  %43 = vst.msk [vmem:[#allocation3 + $0x28] sm:$0xff] %vm29_vm0, %v577_v26  ;;  %v668_v27 = vld [vmem:[#allocation2] sm:$0xff]  ;;  %v675_v32 = vld [vmem:[#allocation2 + $0x8] sm:$0xff] }
  0x16   :  { %95 = vmax.xlane.f32.xlu1 %v94_v12  ;;  %44 = vst.msk [vmem:[#allocation3 + $0x30] sm:$0xff] %vm29_vm0, %v577_v26  ;;  %45 = vst.msk [vmem:[#allocation3 + $0x38] sm:$0xff] %vm29_vm0, %v577_v26  ;;  %v670_v28 = vld [vmem:[#allocation2 + $0x10] sm:$0xff]  ;;  %v685_v35 = vld [vmem:[#allocation2 + $0x18] sm:$0xff] }
  0x17   :  { %46 = vst.msk [vmem:[#allocation4] sm:$0xff] %vm29_vm0, %v577_v26  ;;  %47 = vst.msk [vmem:[#allocation4 + $0x8] sm:$0xff] %vm29_vm0, %v577_v26  ;;  %v700_v42 = vld [vmem:[#allocation2 + $0x20] sm:$0xff]  ;;  %v707_v44 = vld [vmem:[#allocation2 + $0x28] sm:$0xff] }
  0x18   :  { %98 = vmax.xlane.f32.xlu0 %v97_v17  ;;  %48 = vst.msk [vmem:[#allocation4 + $0x10] sm:$0xff] %vm29_vm0, %v577_v26  ;;  %49 = vst.msk [vmem:[#allocation4 + $0x18] sm:$0xff] %vm29_vm0, %v577_v26  ;;  %v722_v51 = vld [vmem:[#allocation2 + $0x30] sm:$0xff]  ;;  %v729_v53 = vld [vmem:[#allocation2 + $0x38] sm:$0xff] }
  0x19   :  { %50 = vst.msk [vmem:[#allocation4 + $0x20] sm:$0xff] %vm29_vm0, %v577_v26  ;;  %51 = vst.msk [vmem:[#allocation4 + $0x28] sm:$0xff] %vm29_vm0, %v577_v26  ;;  %v75_v54 = vld [vmem:[%s888_s1 + $0x28] sm:$0xff]  ;;  %v77_v61 = vld [vmem:[%s888_s1 + $0x38] sm:$0xff] }
  0x1a   :  { %101 = vmax.xlane.f32.xlu1 %v100_v18  ;;  %52 = vst.msk [vmem:[#allocation4 + $0x30] sm:$0xff] %vm29_vm0, %v577_v26  ;;  %53 = vst.msk [vmem:[#allocation4 + $0x38] sm:$0xff] %vm29_vm0, %v577_v26  ;;  %v70_v63 = vld [vmem:[%s888_s1] sm:$0xff]  ;;  %v72_v0 = vld [vmem:[%s888_s1 + $0x10] sm:$0xff] }
  0x1b   :  { %v74_v4 = vld [vmem:[%s888_s1 + $0x20] sm:$0xff]  ;;  %v76_v8 = vld [vmem:[%s888_s1 + $0x30] sm:$0xff] }
  0x1c   :  { %104 = vmax.xlane.f32.xlu0 %v103_v23 }
  0x1e   :  { %107 = vmax.xlane.f32.xlu1 %v106_v24 }
  0x99   :  { %v87_v29 = vpop.xlane.xlu0 %86 }
  0x9a   :  { %v673_v30 = vmax.f32 %v668_v27, %v87_v29 }
  0x9b   :  { %v93_v31 = vpop.xlane.xlu1 %92 }
  0x9c   :  { %v678_v33 = vmax.f32 %v670_v28, %v93_v31  ;;  %v125_v34 = vsub.f32 %v668_v27, %v673_v30  ;;  %398 = vst.msk [vmem:[#allocation2] sm:$0xff] %vm29_vm0, %v673_v30  ;;  %151 = vperm.xlu0 %484, %v673_v30   ;;  %v237_v30 = vld [vmem:[#allocation3] sm:$0xff] }
  0x9d   :  { %v90_v36 = vpop.xlane.xlu0 %89 }
  0x9e   :  { %v127_v38 = vsub.f32 %v670_v28, %v678_v33  ;;  %400 = vst.msk [vmem:[#allocation2 + $0x10] sm:$0xff] %vm29_vm0, %v678_v33  ;;  %v695_v39 = vmax.f32 %v675_v32, %v90_v36 }
  0x9f   :  { %v96_v40 = vpop.xlane.xlu1 %95 }
  0xa0   :  { %v698_v41 = vmax.f32 %v685_v35, %v96_v40  ;;  %v126_v43 = vsub.f32 %v675_v32, %v695_v39  ;;  %399 = vst.msk [vmem:[#allocation2 + $0x8] sm:$0xff] %vm29_vm0, %v695_v39  ;;  %156 = vperm.xlu1 %485, %v695_v39   ;;  %306 = vperm.xlu0 %484, %v71_v37  }
  0xa1   :  { %v99_v47 = vpop.xlane.xlu0 %98 }
  0xa2   :  { %v128_v46 = vsub.f32 %v685_v35, %v698_v41  ;;  %401 = vst.msk [vmem:[#allocation2 + $0x18] sm:$0xff] %vm29_vm0, %v698_v41  ;;  %v717_v48 = vmax.f32 %v700_v42, %v99_v47 }
  0xa3   :  { %v102_v49 = vpop.xlane.xlu1 %101 }
  0xa4   :  { %v720_v50 = vmax.f32 %v707_v44, %v102_v49  ;;  %161 = vperm.xlu1 %485, %v678_v33   ;;  %312 = vperm.xlu0 %484, %v73_v45   ;;  %v129_v52 = vsub.f32 %v700_v42, %v717_v48  ;;  %402 = vst.msk [vmem:[#allocation2 + $0x20] sm:$0xff] %vm29_vm0, %v717_v48 }
  0xa5   :  { %v105_v56 = vpop.xlane.xlu0 %104 }
  0xa6   :  { %v130_v55 = vsub.f32 %v707_v44, %v720_v50  ;;  %403 = vst.msk [vmem:[#allocation2 + $0x28] sm:$0xff] %vm29_vm0, %v720_v50  ;;  %v739_v57 = vmax.f32 %v722_v51, %v105_v56 }
  0xa7   :  { %v108_v58 = vpop.xlane.xlu1 %107 }
  0xa8   :  { %v742_v59 = vmax.f32 %v729_v53, %v108_v58  ;;  %166 = vperm.xlu1 %485, %v698_v41   ;;  %318 = vperm.xlu0 %484, %v75_v54   ;;  %v131_v60 = vsub.f32 %v722_v51, %v739_v57  ;;  %404 = vst.msk [vmem:[#allocation2 + $0x30] sm:$0xff] %vm29_vm0, %v739_v57  ;;  %v143_v32 = vmul.f32 1.442695, %v130_v55 }
  0xaa   :  { %v132_v62 = vsub.f32 %v729_v53, %v742_v59  ;;  %405 = vst.msk [vmem:[#allocation2 + $0x38] sm:$0xff] %vm29_vm0, %v742_v59  ;;  %v145_v35 = vmul.f32 1.442695, %v131_v60 }
  0xac   :  { %171 = vperm.xlu1 %485, %v717_v48   ;;  %324 = vperm.xlu0 %484, %v77_v61   ;;  %v147_v44 = vmul.f32 1.442695, %v132_v62 }
  0xb0   :  { %176 = vperm.xlu1 %485, %v720_v50  }
  0xb4   :  { %181 = vperm.xlu1 %485, %v739_v57  }
  0xb8   :  { %186 = vperm.xlu1 %485, %v742_v59  }
  0xbc   :  { %303 = vperm.xlu1 %485, %v70_v63  }
  0xc0   :  { %309 = vperm.xlu1 %485, %v72_v0  }
  0xc4   :  { %315 = vperm.xlu1 %485, %v74_v4  }
  0xc8   :  { %321 = vperm.xlu1 %485, %v76_v8  }
 0x117   :  { %v152_v11 = vpop.permute.xlu0 %151 }
 0x118   :  { %v189_v12 = vsub.f32 %v604_v1, %v152_v11  ;;  %v190_v17 = vsub.f32 %v606_v2, %v152_v11 }
 0x11a   :  { %v205_v18 = vmul.f32 1.442695, %v189_v12  ;;  %v207_v23 = vmul.f32 1.442695, %v190_v17 }
 0x11b   :  { %v157_v24 = vpop.permute.xlu1 %156 }
 0x11c   :  { %486 = vpow2.f32 %v205_v18  ;;  %v191_v25 = vsub.f32 %v608_v3, %v157_v24  ;;  %v192_v26 = vsub.f32 %v612_v5, %v157_v24 }
 0x11d   :  { %488 = vpow2.f32 %v207_v23 }
 0x11e   :  { %v209_v29 = vmul.f32 1.442695, %v191_v25  ;;  %v211_v31 = vmul.f32 1.442695, %v192_v26 }
 0x11f   :  { %v162_v36 = vpop.permute.xlu1 %161 }
 0x120   :  { %490 = vpow2.f32 %v209_v29  ;;  %v193_v37 = vsub.f32 %v614_v6, %v162_v36  ;;  %v194_v40 = vsub.f32 %v616_v7, %v162_v36 }
 0x121   :  { %492 = vpow2.f32 %v211_v31 }
 0x122   :  { %v213_v45 = vmul.f32 1.442695, %v193_v37  ;;  %v215_v47 = vmul.f32 1.442695, %v194_v40 }
 0x123   :  { %v167_v49 = vpop.permute.xlu1 %166 }
 0x124   :  { %494 = vpow2.f32 %v213_v45  ;;  %v195_v54 = vsub.f32 %v620_v9, %v167_v49  ;;  %v196_v56 = vsub.f32 %v622_v10, %v167_v49 }
 0x125   :  { %496 = vpow2.f32 %v215_v47 }
 0x126   :  { %v217_v58 = vmul.f32 1.442695, %v195_v54  ;;  %v219_v61 = vmul.f32 1.442695, %v196_v56 }
 0x127   :  { %v172_v63 = vpop.permute.xlu1 %171 }
 0x128   :  { %498 = vpow2.f32 %v217_v58  ;;  %v197_v0 = vsub.f32 %v628_v13, %v172_v63  ;;  %v198_v4 = vsub.f32 %v630_v14, %v172_v63 }
 0x129   :  { %v487_v8 = vpop.eup %486  ;;  %500 = vpow2.f32 %v219_v61 }
 0x12a   :  { %v489_v11 = vpop.eup %488  ;;  %v221_v12 = vmul.f32 1.442695, %v197_v0  ;;  %v223_v17 = vmul.f32 1.442695, %v198_v4 }
 0x12b   :  { %v177_v18 = vpop.permute.xlu1 %176  ;;  %v253_v23 = vadd.f32 %v489_v11, %v487_v8 }
 0x12c   :  { %502 = vpow2.f32 %v221_v12  ;;  %v199_v24 = vsub.f32 %v632_v15, %v177_v18  ;;  %v200_v25 = vsub.f32 %v634_v16, %v177_v18  ;;  %v78_v18 = vlaneseq }
 0x12d   :  { %v491_v26 = vpop.eup %490  ;;  %504 = vpow2.f32 %v223_v17  ;;  %254 = vadd.xlane.f32.xlu1 %v253_v23 }
 0x12e   :  { %v493_v29 = vpop.eup %492  ;;  %v225_v31 = vmul.f32 1.442695, %v199_v24  ;;  %v227_v36 = vmul.f32 1.442695, %v200_v25 }
 0x12f   :  { %v182_v37 = vpop.permute.xlu1 %181  ;;  %v256_v40 = vadd.f32 %v493_v29, %v491_v26  ;;  %v788_v29 = vand.u32 127, %v78_v18 }
 0x130   :  { %506 = vpow2.f32 %v225_v31  ;;  %v201_v45 = vsub.f32 %v640_v19, %v182_v37  ;;  %v202_v47 = vsub.f32 %v642_v20, %v182_v37 }
 0x131   :  { %v495_v49 = vpop.eup %494  ;;  %508 = vpow2.f32 %v227_v36  ;;  %257 = vadd.xlane.f32.xlu0 %v256_v40  ;;  %v307_v36 = vpop.permute.xlu0 %306 }
 0x132   :  { %v497_v54 = vpop.eup %496  ;;  %v229_v56 = vmul.f32 1.442695, %v201_v45  ;;  %v231_v58 = vmul.f32 1.442695, %v202_v47  ;;  %v80_v47 = vadd.s32 128, %v788_v29  ;;  %vm328_vm3 = vcmp.eq.s32.totalorder %v788_v29, %v307_v36 }
 0x133   :  { %v187_v61 = vpop.permute.xlu1 %186  ;;  %v259_v63 = vadd.f32 %v497_v54, %v495_v49  ;;  %v344_v18 = vsel %vm328_vm3, %v608_v3, 0.0 }
 0x134   :  { %510 = vpow2.f32 %v229_v56  ;;  %v203_v0 = vsub.f32 %v644_v21, %v187_v61  ;;  %v204_v4 = vsub.f32 %v646_v22, %v187_v61  ;;  %vm329_vm4 = vcmp.eq.s32.totalorder %v80_v47, %v307_v36 }
 0x135   :  { %v499_v8 = vpop.eup %498  ;;  %512 = vpow2.f32 %v231_v58  ;;  %260 = vadd.xlane.f32.xlu0 %v259_v63  ;;  %v313_v58 = vpop.permute.xlu0 %312 }
 0x136   :  { %v501_v11 = vpop.eup %500  ;;  %v233_v12 = vmul.f32 1.442695, %v203_v0  ;;  %v235_v17 = vmul.f32 1.442695, %v204_v4  ;;  %vm332_vm7 = vcmp.eq.s32.totalorder %v788_v29, %v313_v58  ;;  %vm333_vm8 = vcmp.eq.s32.totalorder %v80_v47, %v313_v58  ;;  %v241_v58 = vld [vmem:[#allocation3 + $0x20] sm:$0xff] }
 0x137   :  { %v262_v23 = vadd.f32 %v501_v11, %v499_v8  ;;  %v304_v24 = vpop.permute.xlu1 %303  ;;  %v348_v3 = vsel %vm332_vm7, %v620_v9, 0.0 }
 0x138   :  { %514 = vpow2.f32 %v233_v12  ;;  %vm326_vm1 = vcmp.eq.s32.totalorder %v788_v29, %v304_v24  ;;  %vm327_vm2 = vcmp.eq.s32.totalorder %v80_v47, %v304_v24 }
 0x139   :  { %v503_v25 = vpop.eup %502  ;;  %516 = vpow2.f32 %v235_v17  ;;  %263 = vadd.xlane.f32.xlu1 %v262_v23  ;;  %v342_v0 = vsel %vm326_vm1, %v604_v1, 0.0  ;;  %v343_v4 = vsel %vm327_vm2, %v606_v2, 0.0  ;;  %v319_v23 = vpop.permute.xlu0 %318  ;;  %v345_v2 = vsel %vm329_vm4, %v612_v5, 0.0 }
 0x13a   :  { %v505_v26 = vpop.eup %504  ;;  %v358_v12 = vadd.f32 %v343_v4, %v342_v0  ;;  %vm336_vm11 = vcmp.eq.s32.totalorder %v788_v29, %v319_v23  ;;  %vm337_vm12 = vcmp.eq.s32.totalorder %v80_v47, %v319_v23  ;;  %v242_v4 = vld [vmem:[#allocation3 + $0x28] sm:$0xff]  ;;  %v243_v23 = vld [vmem:[#allocation3 + $0x30] sm:$0xff] }
 0x13b   :  { %v265_v31 = vadd.f32 %v505_v26, %v503_v25  ;;  %v310_v45 = vpop.permute.xlu1 %309 }
 0x13c   :  { %vm330_vm5 = vcmp.eq.s32.totalorder %v788_v29, %v310_v45  ;;  %vm331_vm6 = vcmp.eq.s32.totalorder %v80_v47, %v310_v45 }
 0x13d   :  { %v507_v37 = vpop.eup %506  ;;  %266 = vadd.xlane.f32.xlu0 %v265_v31  ;;  %v346_v24 = vsel %vm330_vm5, %v614_v6, 0.0  ;;  %v347_v1 = vsel %vm331_vm6, %v616_v7, 0.0  ;;  %v361_v31 = vadd.f32 %v345_v2, %v344_v18  ;;  %v349_v7 = vsel %vm333_vm8, %v622_v10, 0.0  ;;  %v325_v5 = vpop.permute.xlu0 %324 }
 0x13e   :  { %v509_v40 = vpop.eup %508  ;;  %v364_v26 = vadd.f32 %v347_v1, %v346_v24  ;;  %vm340_vm15 = vcmp.eq.s32.totalorder %v788_v29, %v325_v5  ;;  %vm341_vm1 = vcmp.eq.s32.totalorder %v80_v47, %v325_v5 }
 0x13f   :  { %v268_v49 = vadd.f32 %v509_v40, %v507_v37  ;;  %v316_v63 = vpop.permute.xlu1 %315  ;;  %v367_v40 = vadd.f32 %v349_v7, %v348_v3 }
 0x140   :  { %vm334_vm9 = vcmp.eq.s32.totalorder %v788_v29, %v316_v63  ;;  %vm335_vm10 = vcmp.eq.s32.totalorder %v80_v47, %v316_v63 }
 0x141   :  { %v511_v54 = vpop.eup %510  ;;  %269 = vadd.xlane.f32.xlu1 %v268_v49  ;;  %v350_v36 = vsel %vm334_vm9, %v628_v13, 0.0  ;;  %v351_v6 = vsel %vm335_vm10, %v630_v14, 0.0  ;;  %v352_v49 = vsel %vm336_vm11, %v632_v15, 0.0  ;;  %v353_v13 = vsel %vm337_vm12, %v634_v16, 0.0 }
 0x142   :  { %v513_v56 = vpop.eup %512  ;;  %v370_v37 = vadd.f32 %v351_v6, %v350_v36  ;;  %v373_v14 = vadd.f32 %v353_v13, %v352_v49  ;;  %v133_v15 = vmul.f32 1.442695, %v125_v34  ;;  %v135_v16 = vmul.f32 1.442695, %v126_v43  ;;  %v294_v6 = vld [vmem:[#allocation4] sm:$0xff]  ;;  %v295_v13 = vld [vmem:[#allocation4 + $0x8] sm:$0xff] }
 0x143   :  { %v271_v61 = vadd.f32 %v513_v56, %v511_v54  ;;  %v322_v25 = vpop.permute.xlu1 %321  ;;  %v356_v54 = vsel %vm340_vm15, %v644_v21, 0.0  ;;  %v357_v56 = vsel %vm341_vm1, %v646_v22, 0.0  ;;  %v139_v21 = vmul.f32 1.442695, %v128_v46  ;;  %v239_v46 = vld [vmem:[#allocation3 + $0x10] sm:$0xff] }
 0x144   :  { %vm338_vm13 = vcmp.eq.s32.totalorder %v788_v29, %v322_v25  ;;  %vm339_vm14 = vcmp.eq.s32.totalorder %v80_v47, %v322_v25  ;;  %518 = vpow2.f32 %v133_v15  ;;  %v141_v22 = vmul.f32 1.442695, %v129_v52  ;;  %v240_v29 = vld [vmem:[#allocation3 + $0x18] sm:$0xff] }
 0x145   :  { %v515_v8 = vpop.eup %514  ;;  %272 = vadd.xlane.f32.xlu0 %v271_v61  ;;  %v354_v45 = vsel %vm338_vm13, %v640_v19, 0.0  ;;  %v355_v9 = vsel %vm339_vm14, %v642_v20, 0.0  ;;  %v379_v19 = vadd.f32 %v357_v56, %v356_v54  ;;  %520 = vpow2.f32 %v135_v16 }
 0x146   :  { %v517_v11 = vpop.eup %516  ;;  %v376_v10 = vadd.f32 %v355_v9, %v354_v45  ;;  %v137_v20 = vmul.f32 1.442695, %v127_v38  ;;  %v238_v38 = vld [vmem:[#allocation3 + $0x8] sm:$0xff] }
 0x147   :  { %v274_v17 = vadd.f32 %v517_v11, %v515_v8 }
 0x148   :  { %522 = vpow2.f32 %v137_v20 }
 0x149   :  { %359 = vadd.xlane.f32.xlu0 %v358_v12  ;;  %275 = vadd.xlane.f32.xlu1 %v274_v17  ;;  %524 = vpow2.f32 %v139_v21 }
 0x14a   :  { %526 = vpow2.f32 %v141_v22  ;;  %v297_v22 = vld [vmem:[#allocation4 + $0x18] sm:$0xff] }
 0x14b   :  { %528 = vpow2.f32 %v143_v32 }
 0x14c   :  { %530 = vpow2.f32 %v145_v35 }
 0x14d   :  { %365 = vadd.xlane.f32.xlu0 %v364_v26  ;;  %362 = vadd.xlane.f32.xlu1 %v361_v31  ;;  %532 = vpow2.f32 %v147_v44  ;;  %v244_v31 = vld [vmem:[#allocation3 + $0x38] sm:$0xff]  ;;  %v410_v44 = vld [vmem:[#allocation2 + $0x8] sm:$0xff] }
 0x151   :  { %371 = vadd.xlane.f32.xlu0 %v370_v37  ;;  %368 = vadd.xlane.f32.xlu1 %v367_v40  ;;  %v519_v27 = vpop.eup %518 }
 0x152   :  { %v245_v34 = vmul.f32 %v519_v27, %v237_v30  ;;  %v521_v28 = vpop.eup %520  ;;  %v298_v27 = vld [vmem:[#allocation4 + $0x20] sm:$0xff] }
 0x153   :  { %v246_v41 = vmul.f32 %v521_v28, %v238_v38  ;;  %v409_v30 = vld [vmem:[#allocation2] sm:$0xff] }
 0x155   :  { %377 = vadd.xlane.f32.xlu0 %v376_v10  ;;  %374 = vadd.xlane.f32.xlu1 %v373_v14  ;;  %v523_v42 = vpop.eup %522  ;;  %v296_v10 = vld [vmem:[#allocation4 + $0x10] sm:$0xff] }
 0x156   :  { %v247_v50 = vmul.f32 %v523_v42, %v239_v46  ;;  %v525_v52 = vpop.eup %524 }
 0x157   :  { %v248_v57 = vmul.f32 %v525_v52, %v240_v29  ;;  %v527_v60 = vpop.eup %526 }
 0x158   :  { %v249_v53 = vmul.f32 %v527_v60, %v241_v58  ;;  %v529_v59 = vpop.eup %528 }
 0x159   :  { %380 = vadd.xlane.f32.xlu1 %v379_v19  ;;  %v250_v12 = vmul.f32 %v529_v59, %v242_v4  ;;  %v531_v17 = vpop.eup %530 }
 0x15a   :  { %v251_v2 = vmul.f32 %v531_v17, %v243_v23  ;;  %v533_v25 = vpop.eup %532 }
 0x15b   :  { %v252_v7 = vmul.f32 %v533_v25, %v244_v31 }
 0x1b6   :  { %v255_v33 = vpop.xlane.xlu1 %254 }
 0x1b7   :  { %v277_v39 = vadd.f32 %v255_v33, %v245_v34 }
 0x1b9   :  { %286 = vst.msk [vmem:[#allocation3] sm:$0xff] %vm29_vm0, %v277_v39 }
 0x1ba   :  { %v258_v43 = vpop.xlane.xlu0 %257 }
 0x1bb   :  { %v278_v48 = vadd.f32 %v258_v43, %v246_v41  ;;  %v299_v41 = vld [vmem:[#allocation4 + $0x28] sm:$0xff] }
 0x1bd   :  { %287 = vst.msk [vmem:[#allocation3 + $0x8] sm:$0xff] %vm29_vm0, %v278_v48  ;;  %v300_v48 = vld [vmem:[#allocation4 + $0x30] sm:$0xff] }
 0x1be   :  { %v261_v55 = vpop.xlane.xlu0 %260 }
 0x1bf   :  { %v279_v51 = vadd.f32 %v261_v55, %v247_v50  ;;  %v411_v50 = vld [vmem:[#allocation2 + $0x10] sm:$0xff] }
 0x1c0   :  { %v417_v63 = vld [vmem:[#allocation3] sm:$0xff] }
 0x1c1   :  { %288 = vst.msk [vmem:[#allocation3 + $0x10] sm:$0xff] %vm29_vm0, %v279_v51  ;;  %534 = vlog2.f32 %v417_v63 }
 0x1c2   :  { %v264_v47 = vpop.xlane.xlu1 %263 }
 0x1c3   :  { %v280_v61 = vadd.f32 %v264_v47, %v248_v57 }
 0x1c4   :  { %v418_v62 = vld [vmem:[#allocation3 + $0x8] sm:$0xff] }
 0x1c5   :  { %289 = vst.msk [vmem:[#allocation3 + $0x18] sm:$0xff] %vm29_vm0, %v280_v61  ;;  %536 = vlog2.f32 %v418_v62  ;;  %v301_v62 = vld [vmem:[#allocation4 + $0x38] sm:$0xff] }
 0x1c6   :  { %v267_v0 = vpop.xlane.xlu0 %266 }
 0x1c7   :  { %v281_v8 = vadd.f32 %v267_v0, %v249_v53 }
 0x1c8   :  { %v419_v11 = vld [vmem:[#allocation3 + $0x10] sm:$0xff] }
 0x1c9   :  { %290 = vst.msk [vmem:[#allocation3 + $0x20] sm:$0xff] %vm29_vm0, %v281_v8  ;;  %538 = vlog2.f32 %v419_v11  ;;  %v412_v11 = vld [vmem:[#allocation2 + $0x18] sm:$0xff] }
 0x1ca   :  { %v270_v18 = vpop.xlane.xlu1 %269 }
 0x1cb   :  { %v282_v24 = vadd.f32 %v270_v18, %v250_v12  ;;  %v413_v12 = vld [vmem:[#allocation2 + $0x20] sm:$0xff] }
 0x1cc   :  { %v420_v1 = vld [vmem:[#allocation3 + $0x18] sm:$0xff] }
 0x1cd   :  { %291 = vst.msk [vmem:[#allocation3 + $0x28] sm:$0xff] %vm29_vm0, %v282_v24  ;;  %540 = vlog2.f32 %v420_v1 }
 0x1ce   :  { %v273_v26 = vpop.xlane.xlu0 %272  ;;  %v535_v9 = vpop.eup %534 }
 0x1cf   :  { %v283_v3 = vadd.f32 %v273_v26, %v251_v2  ;;  %v426_v15 = vmul.f32 0.6931472, %v535_v9 }
 0x1d0   :  { %v421_v36 = vld [vmem:[#allocation3 + $0x20] sm:$0xff] }
 0x1d1   :  { %542 = vlog2.f32 %v421_v36  ;;  %292 = vst.msk [vmem:[#allocation3 + $0x30] sm:$0xff] %vm29_vm0, %v283_v3  ;;  %v441_v38 = vadd.f32 %v426_v15, %v409_v30  ;;  %v414_v36 = vld [vmem:[#allocation2 + $0x28] sm:$0xff] }
 0x1d2   :  { %v276_v5 = vpop.xlane.xlu1 %275  ;;  %v360_v37 = vpop.xlane.xlu0 %359 }
 0x1d3   :  { %v284_v40 = vadd.f32 %v276_v5, %v252_v7  ;;  %v382_v45 = vadd.f32 %v360_v37, %v294_v6  ;;  %v537_v14 = vpop.eup %536  ;;  %v415_v5 = vld [vmem:[#allocation2 + $0x30] sm:$0xff] }
 0x1d4   :  { %v422_v49 = vld [vmem:[#allocation3 + $0x28] sm:$0xff]  ;;  %v428_v32 = vmul.f32 0.6931472, %v537_v14  ;;  %v416_v14 = vld [vmem:[#allocation2 + $0x38] sm:$0xff] }
 0x1d5   :  { %544 = vlog2.f32 %v422_v49  ;;  %293 = vst.msk [vmem:[#allocation3 + $0x38] sm:$0xff] %vm29_vm0, %v284_v40  ;;  %390 = vst.msk [vmem:[#allocation4] sm:$0xff] %vm29_vm0, %v382_v45 }
 0x1d6   :  { %v363_v54 = vpop.xlane.xlu1 %362  ;;  %v366_v56 = vpop.xlane.xlu0 %365  ;;  %v442_v29 = vadd.f32 %v428_v32, %v410_v44 }
 0x1d7   :  { %v539_v19 = vpop.eup %538  ;;  %v383_v16 = vadd.f32 %v363_v54, %v295_v13  ;;  %v384_v20 = vadd.f32 %v366_v56, %v296_v10 }
 0x1d8   :  { %v423_v21 = vld [vmem:[#allocation3 + $0x30] sm:$0xff]  ;;  %v430_v34 = vmul.f32 0.6931472, %v539_v19 }
 0x1d9   :  { %546 = vlog2.f32 %v423_v21  ;;  %391 = vst.msk [vmem:[#allocation4 + $0x8] sm:$0xff] %vm29_vm0, %v383_v16  ;;  %392 = vst.msk [vmem:[#allocation4 + $0x10] sm:$0xff] %vm29_vm0, %v384_v20 }
 0x1da   :  { %v369_v28 = vpop.xlane.xlu1 %368  ;;  %v372_v33 = vpop.xlane.xlu0 %371  ;;  %v443_v51 = vadd.f32 %v430_v34, %v411_v50 }
 0x1db   :  { %v385_v39 = vadd.f32 %v369_v28, %v297_v22  ;;  %v386_v35 = vadd.f32 %v372_v33, %v298_v27  ;;  %v541_v42 = vpop.eup %540 }
 0x1dc   :  { %v424_v43 = vld [vmem:[#allocation3 + $0x38] sm:$0xff]  ;;  %v449_v46 = vld [vmem:[#allocation4] sm:$0xff]  ;;  %v432_v47 = vmul.f32 0.6931472, %v541_v42 }
 0x1dd   :  { %548 = vlog2.f32 %v424_v43  ;;  %v457_v52 = vsub.f32 %v441_v38, %v449_v46  ;;  %393 = vst.msk [vmem:[#allocation4 + $0x18] sm:$0xff] %vm29_vm0, %v385_v39  ;;  %394 = vst.msk [vmem:[#allocation4 + $0x20] sm:$0xff] %vm29_vm0, %v386_v35 }
 0x1de   :  { %v543_v55 = vpop.eup %542  ;;  %v375_v57 = vpop.xlane.xlu1 %374  ;;  %v444_v18 = vadd.f32 %v432_v47, %v412_v11 }
 0x1df   :  { %v378_v60 = vpop.xlane.xlu0 %377  ;;  %465 = vst.msk [vmem:[%s889_s2] sm:$0xff] %vm29_vm0, %v457_v52  ;;  %v434_v58 = vmul.f32 0.6931472, %v543_v55  ;;  %v387_v61 = vadd.f32 %v375_v57, %v299_v41 }
 0x1e0   :  { %v388_v63 = vadd.f32 %v378_v60, %v300_v48  ;;  %v450_v53 = vld [vmem:[#allocation4 + $0x8] sm:$0xff]  ;;  %v451_v59 = vld [vmem:[#allocation4 + $0x10] sm:$0xff] }
 0x1e1   :  { %v458_v0 = vsub.f32 %v442_v29, %v450_v53  ;;  %v459_v4 = vsub.f32 %v443_v51, %v451_v59  ;;  %395 = vst.msk [vmem:[#allocation4 + $0x28] sm:$0xff] %vm29_vm0, %v387_v61  ;;  %v445_v23 = vadd.f32 %v434_v58, %v413_v12 }
 0x1e2   :  { %396 = vst.msk [vmem:[#allocation4 + $0x30] sm:$0xff] %vm29_vm0, %v388_v63  ;;  %v545_v8 = vpop.eup %544  ;;  %v381_v17 = vpop.xlane.xlu1 %380 }
 0x1e3   :  { %466 = vst.msk [vmem:[%s889_s2 + $0x8] sm:$0xff] %vm29_vm0, %v458_v0  ;;  %467 = vst.msk [vmem:[%s889_s2 + $0x10] sm:$0xff] %vm29_vm0, %v459_v4  ;;  %v436_v24 = vmul.f32 0.6931472, %v545_v8  ;;  %v389_v1 = vadd.f32 %v381_v17, %v301_v62 }
 0x1e4   :  { %v452_v2 = vld [vmem:[#allocation4 + $0x18] sm:$0xff]  ;;  %v453_v25 = vld [vmem:[#allocation4 + $0x20] sm:$0xff] }
 0x1e5   :  { %v460_v26 = vsub.f32 %v444_v18, %v452_v2  ;;  %v461_v31 = vsub.f32 %v445_v23, %v453_v25  ;;  %397 = vst.msk [vmem:[#allocation4 + $0x38] sm:$0xff] %vm29_vm0, %v389_v1  ;;  %v446_v6 = vadd.f32 %v436_v24, %v414_v36 }
 0x1e6   :  { %v547_v3 = vpop.eup %546 }
 0x1e7   :  { %468 = vst.msk [vmem:[%s889_s2 + $0x18] sm:$0xff] %vm29_vm0, %v460_v26  ;;  %469 = vst.msk [vmem:[%s889_s2 + $0x20] sm:$0xff] %vm29_vm0, %v461_v31  ;;  %v438_v7 = vmul.f32 0.6931472, %v547_v3 }
 0x1e8   :  { %v454_v37 = vld [vmem:[#allocation4 + $0x28] sm:$0xff] }
 0x1e9   :  { %v462_v40 = vsub.f32 %v446_v6, %v454_v37  ;;  %v447_v45 = vadd.f32 %v438_v7, %v415_v5  ;;  %v455_v49 = vld [vmem:[#allocation4 + $0x30] sm:$0xff] }
 0x1ea   :  { %v549_v9 = vpop.eup %548 }
 0x1eb   :  { %470 = vst.msk [vmem:[%s889_s2 + $0x28] sm:$0xff] %vm29_vm0, %v462_v40  ;;  %v463_v13 = vsub.f32 %v447_v45, %v455_v49  ;;  %v440_v10 = vmul.f32 0.6931472, %v549_v9 }
 0x1ec   :  { %v456_v56 = vld [vmem:[#allocation4 + $0x38] sm:$0xff] }
 0x1ed   :  { %471 = vst.msk [vmem:[%s889_s2 + $0x30] sm:$0xff] %vm29_vm0, %v463_v13  ;;  %v448_v54 = vadd.f32 %v440_v10, %v416_v14 }
 0x1ef   :  { %v464_v19 = vsub.f32 %v448_v54, %v456_v56 }
 0x1f1   :  { %472 = vst.msk [vmem:[%s889_s2 + $0x38] sm:$0xff] %vm29_vm0, %v464_v19 }
 0x1f2   :  { %477 = vsyncpa [#allocation6], 1 }

</bundles_post_ra>
